<compile_context>
chip_gen: v6e
topology: v6e:2x2x1
jax: 0.10.0
libtpu: 0.0.40
codegen_flags: <defaults>
</compile_context>

<pallas_src>
import functools

import jax
import jax.numpy as jnp
from jax.experimental import pallas as pl
from jax.experimental.pallas import tpu as pltpu


def _round_up(x, m):
    return (x + m - 1) // m * m


# ----------------------------- Pallas kernel ------------------------------- #
def _grouped_ffn_kernel(tile_expert_ref, nvalid_ref, x_ref, wgu_ref, wd_ref,
                        w_ref, o_ref, acc_ref, *, block_i):
    """One (row-tile r, I-chunk k) grid step of the grouped SwiGLU FFN.

    x_ref:   (bm, H)        bf16  token rows of one expert
    wgu_ref: (H, 2*block_i) bf16  fused gate||up weight chunk of that expert
    wd_ref:  (block_i, H)   bf16  down-projection weight chunk
    w_ref:   (bm, 1)        f32   per-row routing weights
    o_ref:   (bm, H)        f32   routing-scaled expert output
    acc_ref: (bm, H)        f32   VMEM accumulator over I-chunks
    """
    del tile_expert_ref                       # consumed only by the index_maps
    r = pl.program_id(0)
    k = pl.program_id(1)

    @pl.when(r < nvalid_ref[0])               # skip fully-padded trailing tiles
    def _():
        @pl.when(k == 0)
        def _():
            acc_ref[...] = jnp.zeros_like(acc_ref)

        x = x_ref[...]                                                    # (bm, H)
        gu = jnp.dot(x, wgu_ref[...], preferred_element_type=jnp.float32)  # (bm, 2*bi)
        g = gu[:, :block_i]
        u = gu[:, block_i:]
        h = (g * jax.nn.sigmoid(g) * u).astype(wd_ref.dtype)             # SiLU(g)*u
        acc_ref[...] += jnp.dot(h, wd_ref[...],
                                preferred_element_type=jnp.float32)       # (bm, H)

        @pl.when(k == pl.num_programs(1) - 1)
        def _():
            # Routing-weight scale fused into the kernel (f32 before store).
            o_ref[...] = (acc_ref[...] * w_ref[...]).astype(o_ref.dtype)


def grouped_ffn_pallas(x_pad, w_pad, tile_expert, num_valid_tiles, wgu, wd,
                       *, block_m, block_i, out_dtype=jnp.float32):
    """Grouped expert FFN over a padded, expert-sorted dispatch buffer."""
    M_pad, H = x_pad.shape
    E, num_k, _, two_bi = wgu.shape
    assert two_bi == 2 * block_i
    num_tiles = M_pad // block_m
    I_pad = num_k * block_i

    # Advisory cost so XLA schedules the surrounding gather/scatter sensibly.
    cost = pl.CostEstimate(
        flops=6 * M_pad * H * I_pad,
        transcendentals=M_pad * I_pad,
        bytes_accessed=(M_pad * H * (2 + 4) + M_pad * 4
                        + E * 3 * H * I_pad * 2),
    )

    # Explicit VMEM budget: double-buffered inputs/outputs + f32 accumulator,
    # generous headroom, capped at v7x's 64 MiB physical VMEM per TensorCore.
    step_bytes = (block_m * H * 2            # x tile (bf16)
                  + H * 2 * block_i * 2      # Wg||Wu chunk (bf16)
                  + block_i * H * 2          # Wd chunk (bf16)
                  + block_m * 4              # routing weights
                  + block_m * H * 4)         # output tile (f32)
    vmem_limit = min(2 * step_bytes + block_m * H * 4 + (16 << 20), 64 << 20)

    kernel = functools.partial(_grouped_ffn_kernel, block_i=block_i)
    return pl.pallas_call(
        kernel,
        out_shape=jax.ShapeDtypeStruct((M_pad, H), out_dtype),
        grid_spec=pltpu.PrefetchScalarGridSpec(
            num_scalar_prefetch=2,            # tile_expert + num_valid in SMEM
            grid=(num_tiles, num_k),          # reduction (I) axis last
            in_specs=[
                pl.BlockSpec((block_m, H), lambda r, k, te, nv: (r, 0)),
                pl.BlockSpec((None, None, H, 2 * block_i),
                             lambda r, k, te, nv: (te[r], k, 0, 0)),      # Wg||Wu[e,k]
                pl.BlockSpec((None, block_i, H),
                             lambda r, k, te, nv: (te[r], k, 0)),          # Wd[e,k]
                pl.BlockSpec((block_m, 1), lambda r, k, te, nv: (r, 0)),   # weights
            ],
            out_specs=pl.BlockSpec((block_m, H), lambda r, k, te, nv: (r, 0)),
            scratch_shapes=[pltpu.VMEM((block_m, H), jnp.float32)],
        ),
        compiler_params=pltpu.CompilerParams(
            # TODO(synk): on v7x megacore, "parallel" over row tiles may
            # duplicate expert-weight DMA across the two TensorCores; a
            # per-expert core split would keep total weight bytes constant.
            dimension_semantics=("parallel", "arbitrary"),
            vmem_limit_bytes=vmem_limit),
        cost_estimate=cost,
    )(tile_expert, num_valid_tiles, x_pad, wgu, wd, w_pad)


# ------------------------------ JAX glue ----------------------------------- #
def gate_topk(x_flat, gate_w, top_k, norm_topk_prob):
    """MoEGate scoring: softmax over routed experts + top-k (+ optional renorm)."""
    logits = x_flat @ gate_w.T                                # (T, E_routed)
    scores = jax.nn.softmax(logits.astype(jnp.float32), axis=-1)
    topk_w, topk_idx = jax.lax.top_k(scores, top_k)           # (T, k)
    if top_k > 1 and norm_topk_prob:
        topk_w = topk_w / (jnp.sum(topk_w, axis=-1, keepdims=True) + 1e-20)
    return topk_w, topk_idx


def moe_feedforward(x, params, *, top_k=2, norm_topk_prob=True,
                    block_m=128, block_i=512):
    """Inference-mode MOEFeedForward.forward (aux_loss = 0 in eval)."""
    B, S, H = x.shape
    x_flat = x.reshape(-1, H)
    T = x_flat.shape[0]

    E_total, _, I = params["wg"].shape
    n_routed = params["gate_w"].shape[0]
    n_shared = E_total - n_routed

    assert block_m % 16 == 0, "block_m must be a multiple of 16 (bf16 sublanes)"
    block_i = min(block_i, _round_up(I, 128))
    assert block_i % 128 == 0, "block_i must be a multiple of 128 (lane width)"

    topk_w, topk_idx = gate_topk(x_flat, params["gate_w"], top_k, norm_topk_prob)

    # Flat assignment list: top_k routed per token + one per shared expert/token.
    routed_tok = jnp.repeat(jnp.arange(T, dtype=jnp.int32), top_k)
    routed_exp = topk_idx.reshape(-1).astype(jnp.int32)
    routed_w = topk_w.reshape(-1).astype(jnp.float32)
    shared_tok = jnp.tile(jnp.arange(T, dtype=jnp.int32), n_shared)
    shared_exp = jnp.repeat(n_routed + jnp.arange(n_shared, dtype=jnp.int32), T)
    shared_w = jnp.ones((T * n_shared,), dtype=jnp.float32)

    tok = jnp.concatenate([routed_tok, shared_tok])
    expert = jnp.concatenate([routed_exp, shared_exp])
    wgt = jnp.concatenate([routed_w, shared_w])
    N = int(tok.shape[0])                       # static: T*top_k + T*n_shared

    # Sort assignments by expert id -> contiguous per-expert groups.
    order = jnp.argsort(expert)
    s_exp, s_tok, s_wgt = expert[order], tok[order], wgt[order]

    counts = jnp.bincount(s_exp, length=E_total).astype(jnp.int32)
    padded_counts = ((counts + block_m - 1) // block_m) * block_m
    unpadded_starts = jnp.concatenate(
        [jnp.zeros((1,), jnp.int32), jnp.cumsum(counts).astype(jnp.int32)])[:-1]
    padded_starts = jnp.concatenate(
        [jnp.zeros((1,), jnp.int32), jnp.cumsum(padded_counts).astype(jnp.int32)])[:-1]
    rank = jnp.arange(N, dtype=jnp.int32) - unpadded_starts[s_exp]
    dest = padded_starts[s_exp] + rank          # row in padded dispatch buffer

    # Static upper bound on the padded buffer size (multiple of block_m).
    M_pad = _round_up(N, block_m) + E_total * block_m
    num_tiles = M_pad // block_m

    # Per-row-tile expert id + number of tiles that contain any real rows.
    padded_ends = jnp.cumsum(padded_counts).astype(jnp.int32)
    tile_start = jnp.arange(num_tiles, dtype=jnp.int32) * block_m
    tile_expert = jnp.minimum(
        jnp.searchsorted(padded_ends, tile_start, side="right"),
        E_total - 1).astype(jnp.int32)
    num_valid_tiles = (jnp.sum(padded_counts) // block_m).astype(jnp.int32).reshape(1)

    # Dispatch: gather tokens (bf16 for the MXU) + routing weights in dispatch order.
    # TODO(synk): at large-T prefill, gather rows inside the kernel instead.
    x_bf16 = x_flat.astype(jnp.bfloat16)
    x_pad = jnp.zeros((M_pad, H), jnp.bfloat16).at[dest].set(x_bf16[s_tok])
    w_pad = jnp.zeros((M_pad, 1), jnp.float32).at[dest].set(s_wgt[:, None])

    # Weight layout: pad I to a multiple of block_i, fuse gate||up per I-chunk.
    # (In a real model this re-layout is done once at weight-load time.)
    I_pad = _round_up(I, block_i)
    num_k = I_pad // block_i
    wg = params["wg"].astype(jnp.bfloat16)
    wu = params["wu"].astype(jnp.bfloat16)
    wd = params["wd"].astype(jnp.bfloat16)
    if I_pad != I:
        wg = jnp.pad(wg, ((0, 0), (0, 0), (0, I_pad - I)))
        wu = jnp.pad(wu, ((0, 0), (0, 0), (0, I_pad - I)))
        wd = jnp.pad(wd, ((0, 0), (0, I_pad - I), (0, 0)))
    wg_c = wg.reshape(E_total, H, num_k, block_i).transpose(0, 2, 1, 3)
    wu_c = wu.reshape(E_total, H, num_k, block_i).transpose(0, 2, 1, 3)
    wgu = jnp.concatenate([wg_c, wu_c], axis=-1)     # (E, num_k, H, 2*block_i)

    y_pad = grouped_ffn_pallas(x_pad, w_pad, tile_expert, num_valid_tiles,
                               wgu, wd, block_m=block_m, block_i=block_i)

    # Combine: rows are already routing-scaled in-kernel; f32 scatter-add.
    y = jnp.zeros((T, H), jnp.float32).at[s_tok].add(y_pad[dest])
    return y.astype(x.dtype).reshape(B, S, H)


def moe_feedforward_ref(x, params, *, top_k=2, norm_topk_prob=True):
    """Pure-JAX reference (same bf16 matmul precision) for correctness checks."""
    B, S, H = x.shape
    x_flat = x.reshape(-1, H)
    T = x_flat.shape[0]
    E_total = params["wg"].shape[0]
    n_routed = params["gate_w"].shape[0]

    topk_w, topk_idx = gate_topk(x_flat, params["gate_w"], top_k, norm_topk_prob)
    dense = jnp.zeros((T, E_total), jnp.float32)
    dense = dense.at[jnp.arange(T)[:, None], topk_idx].set(topk_w)
    dense = dense.at[:, n_routed:].set(1.0)     # shared experts: weight 1

    x_b = x_flat.astype(jnp.bfloat16)
    y = jnp.zeros((T, H), jnp.float32)
    for e in range(E_total):
        wg = params["wg"][e].astype(jnp.bfloat16)
        wu = params["wu"][e].astype(jnp.bfloat16)
        wd = params["wd"][e].astype(jnp.bfloat16)
        g = jnp.dot(x_b, wg, preferred_element_type=jnp.float32)
        u = jnp.dot(x_b, wu, preferred_element_type=jnp.float32)
        h = (g * jax.nn.sigmoid(g) * u).astype(jnp.bfloat16)
        out = jnp.dot(h, wd, preferred_element_type=jnp.float32)
        y = y + out * dense[:, e:e + 1]
    return y.astype(x.dtype).reshape(B, S, H)


# ------------------------------- main --------------------------------------- #
if __name__ == "__main__":
    # Small but lane-friendly MiniMindConfig-consistent sizes (H multiple of 128).
    hidden_size = 128
    intermediate_size = 64 * ((int(hidden_size * 8 / 3) + 63) // 64)   # -> 384
    n_routed_experts = 4
    n_shared_experts = 1
    top_k = 2
    B, S = 2, 8
    E_total = n_routed_experts + n_shared_experts

    key = jax.random.PRNGKey(0)
    k_x, k_g, k_wg, k_wu, k_wd = jax.random.split(key, 5)

    x = jax.random.normal(k_x, (B, S, hidden_size), dtype=jnp.float32)

    scale = 0.05
    params = {
        # MoEGate weight: (n_routed_experts, hidden_size)
        "gate_w": scale * jax.random.normal(
            k_g, (n_routed_experts, hidden_size), dtype=jnp.float32),
        # Expert weights (pre-transposed vs torch Linear): routed then shared.
        "wg": scale * jax.random.normal(
            k_wg, (E_total, hidden_size, intermediate_size), dtype=jnp.float32),
        "wu": scale * jax.random.normal(
            k_wu, (E_total, hidden_size, intermediate_size), dtype=jnp.float32),
        "wd": scale * jax.random.normal(
            k_wd, (E_total, intermediate_size, hidden_size), dtype=jnp.float32),
    }

    # block_m=128 fills the MXU rows; block_i=128 exercises the I-chunked
    # reduction axis (intermediate 384 -> 3 chunks).
    fwd = functools.partial(moe_feedforward, top_k=top_k,
                            norm_topk_prob=True, block_m=128, block_i=128)
    y = jax.block_until_ready(jax.jit(fwd)(x, params))

    y_ref = moe_feedforward_ref(x, params, top_k=top_k, norm_topk_prob=True)
    assert y.shape == (B, S, hidden_size)
    assert jnp.allclose(y, y_ref, atol=2e-3, rtol=2e-3), "mismatch vs reference"

    print("KERNEL_OK")
</pallas_src>

<mosaic_0001>
module attributes {stable_mosaic.version = 11 : i64} {
  func.func private @main(%arg0: i32) attributes {dimension_semantics = [#tpu.dimension_semantics<core_parallel>], iteration_bounds = array<i64: 2>, tpu.core_type = #tpu.core_type<sc_scalar_subcore>, window_params = []} {
    return
  }
}

module attributes {stable_mosaic.version = 11 : i64} {
  func.func private @main(%arg0: i32) attributes {dimension_semantics = [#tpu.dimension_semantics<core_parallel>], iteration_bounds = array<i64: 2>, tpu.core_type = #tpu.core_type<sc_scalar_subcore>, window_params = []} {
    return
  }
}

module attributes {stable_mosaic.version = 11 : i64} {
  func.func @_grouped_ffn_kernel(%arg0: i32, %arg1: i32, %arg2: memref<6xi32, #tpu.memory_space<smem>>, %arg3: memref<1xi32, #tpu.memory_space<smem>>, %arg4: memref<128x128xbf16, #tpu.memory_space<vmem>>, %arg5: memref<1x1x128x256xbf16, #tpu.memory_space<vmem>>, %arg6: memref<1x128x128xbf16, #tpu.memory_space<vmem>>, %arg7: memref<128x1xf32, #tpu.memory_space<vmem>>, %arg8: memref<128x128xf32, #tpu.memory_space<vmem>>, %arg9: memref<128x128xf32, #tpu.memory_space<vmem>>) attributes {dimension_semantics = [#tpu.dimension_semantics<parallel>, #tpu.dimension_semantics<arbitrary>], iteration_bounds = array<i64: 6, 3>, scalar_prefetch = 2 : i64, scratch_operands = 1 : i64, tpu.core_type = #tpu.core_type<tc>, window_params = [{transform_indices = @transform_0, window_bounds = array<i64: 128, 128>}, {transform_indices = @transform_1, window_bounds = array<i64: 1, 1, 128, 256>}, {transform_indices = @transform_2, window_bounds = array<i64: 1, 128, 128>}, {transform_indices = @transform_3, window_bounds = array<i64: 128, 1>}, {transform_indices = @transform_4, window_bounds = array<i64: 128, 128>}]} {
    %c0 = arith.constant 0 : index
    %0 = memref.load %arg3[%c0] : memref<1xi32, #tpu.memory_space<smem>>
    %1 = arith.cmpi slt, %arg0, %0 : i32
    %2 = arith.extui %1 : i1 to i32
    %c0_i32 = arith.constant 0 : i32
    %3 = arith.cmpi ne, %2, %c0_i32 : i32
    scf.if %3 {
      %c0_i32_0 = arith.constant 0 : i32
      %4 = arith.cmpi eq, %arg1, %c0_i32_0 : i32
      %5 = arith.extui %4 : i1 to i32
      %c0_i32_1 = arith.constant 0 : i32
      %6 = arith.cmpi ne, %5, %c0_i32_1 : i32
      scf.if %6 {
        %cst_18 = arith.constant 0.000000e+00 : f32
        %30 = vector.broadcast %cst_18 : f32 to vector<128x128xf32>
        %c0_19 = arith.constant 0 : index
        %c0_20 = arith.constant 0 : index
        %31 = vector.load %arg9[%c0_19, %c0_20] : memref<128x128xf32, #tpu.memory_space<vmem>>, vector<128x128xf32>
        tpu.vector_store %arg9[%c0_19, %c0_20], %30 {strides = array<i32>} : memref<128x128xf32, #tpu.memory_space<vmem>>, vector<128x128xf32>,
      } else {
      }
      %c0_2 = arith.constant 0 : index
      %c0_3 = arith.constant 0 : index
      %7 = vector.load %arg4[%c0_2, %c0_3] : memref<128x128xbf16, #tpu.memory_space<vmem>>, vector<128x128xbf16>
      %c0_4 = arith.constant 0 : index
      %c0_5 = arith.constant 0 : index
      %c0_6 = arith.constant 0 : index
      %c0_7 = arith.constant 0 : index
      %8 = vector.load %arg5[%c0_4, %c0_5, %c0_6, %c0_7] : memref<1x1x128x256xbf16, #tpu.memory_space<vmem>>, vector<1x1x128x256xbf16>
      %9 = vector.shape_cast %8 : vector<1x1x128x256xbf16> to vector<128x256xbf16>
      %cst = arith.constant dense<0.000000e+00> : vector<128x256xf32>
      %10 = tpu.matmul %7, %9, %cst {dimension_numbers = #tpu.dot_dimension_numbers<[1], [0], [0], [1], [0, 0, 1, 1], [], []>} : vector<128x128xbf16>, vector<128x256xbf16>, vector<128x256xf32> -> vector<128x256xf32>
      %11 = vector.extract_strided_slice %10 {offsets = [0, 0], sizes = [128, 128], strides = [1, 1]} : vector<128x256xf32> to vector<128x128xf32>
      %12 = vector.extract_strided_slice %10 {offsets = [0, 128], sizes = [128, 128], strides = [1, 1]} : vector<128x256xf32> to vector<128x128xf32>
      %13 = arith.negf %11 : vector<128x128xf32>
      %14 = math.exp %13 : vector<128x128xf32>
      %cst_8 = arith.constant 1.000000e+00 : f32
      %15 = vector.broadcast %cst_8 : f32 to vector<128x128xf32>
      %16 = arith.addf %15, %14 : vector<128x128xf32>
      %17 = arith.divf %15, %16 : vector<128x128xf32>
      %18 = arith.mulf %11, %17 : vector<128x128xf32>
      %19 = arith.mulf %18, %12 : vector<128x128xf32>
      %20 = arith.truncf %19 : vector<128x128xf32> to vector<128x128xbf16>
      %c0_9 = arith.constant 0 : index
      %c0_10 = arith.constant 0 : index
      %21 = vector.load %arg9[%c0_9, %c0_10] : memref<128x128xf32, #tpu.memory_space<vmem>>, vector<128x128xf32>
      %c0_11 = arith.constant 0 : index
      %c0_12 = arith.constant 0 : index
      %c0_13 = arith.constant 0 : index
      %22 = vector.load %arg6[%c0_11, %c0_12, %c0_13] : memref<1x128x128xbf16, #tpu.memory_space<vmem>>, vector<1x128x128xbf16>
      %23 = vector.shape_cast %22 : vector<1x128x128xbf16> to vector<128x128xbf16>
      %cst_14 = arith.constant dense<0.000000e+00> : vector<128x128xf32>
      %24 = tpu.matmul %20, %23, %cst_14 {dimension_numbers = #tpu.dot_dimension_numbers<[1], [0], [0], [1], [0, 0, 1, 1], [], []>} : vector<128x128xbf16>, vector<128x128xbf16>, vector<128x128xf32> -> vector<128x128xf32>
      %25 = arith.addf %21, %24 : vector<128x128xf32>
      %c0_15 = arith.constant 0 : index
      %c0_16 = arith.constant 0 : index
      %26 = vector.load %arg9[%c0_15, %c0_16] : memref<128x128xf32, #tpu.memory_space<vmem>>, vector<128x128xf32>
      tpu.vector_store %arg9[%c0_15, %c0_16], %25 {strides = array<i32>} : memref<128x128xf32, #tpu.memory_space<vmem>>, vector<128x128xf32>,
      %c2_i32 = arith.constant 2 : i32
      %27 = arith.cmpi eq, %arg1, %c2_i32 : i32
      %28 = arith.extui %27 : i1 to i32
      %c0_i32_17 = arith.constant 0 : i32
      %29 = arith.cmpi ne, %28, %c0_i32_17 : i32
      scf.if %29 {
        %c0_18 = arith.constant 0 : index
        %c0_19 = arith.constant 0 : index
        %30 = vector.load %arg9[%c0_18, %c0_19] : memref<128x128xf32, #tpu.memory_space<vmem>>, vector<128x128xf32>
        %c0_20 = arith.constant 0 : index
        %c0_21 = arith.constant 0 : index
        %31 = vector.load %arg7[%c0_20, %c0_21] : memref<128x1xf32, #tpu.memory_space<vmem>>, vector<128x1xf32>
        %32 = vector.broadcast %31 : vector<128x1xf32> to vector<128x128xf32>
        %33 = arith.mulf %30, %32 : vector<128x128xf32>
        %c0_22 = arith.constant 0 : index
        %c0_23 = arith.constant 0 : index
        %34 = vector.load %arg8[%c0_22, %c0_23] : memref<128x128xf32, #tpu.memory_space<vmem>>, vector<128x128xf32>
        tpu.vector_store %arg8[%c0_22, %c0_23], %33 {strides = array<i32>} : memref<128x128xf32, #tpu.memory_space<vmem>>, vector<128x128xf32>,
      } else {
      }
    } else {
    }
    return
  }
  func.func @transform_0(%arg0: i32, %arg1: i32, %arg2: memref<6xi32, #tpu.memory_space<smem>>, %arg3: memref<1xi32, #tpu.memory_space<smem>>) -> (i32, i32) {
    %c0_i32 = arith.constant 0 : i32
    %c0_i32_0 = arith.constant 0 : i32
    return %arg0, %c0_i32 : i32, i32
  }
  func.func @transform_1(%arg0: i32, %arg1: i32, %arg2: memref<6xi32, #tpu.memory_space<smem>>, %arg3: memref<1xi32, #tpu.memory_space<smem>>) -> (i32, i32, i32, i32) {
    %0 = arith.index_cast %arg0 : i32 to index
    %1 = memref.load %arg2[%0] : memref<6xi32, #tpu.memory_space<smem>>
    %c0_i32 = arith.constant 0 : i32
    %c0_i32_0 = arith.constant 0 : i32
    %c0_i32_1 = arith.constant 0 : i32
    return %1, %arg1, %c0_i32, %c0_i32_0 : i32, i32, i32, i32
  }
  func.func @transform_2(%arg0: i32, %arg1: i32, %arg2: memref<6xi32, #tpu.memory_space<smem>>, %arg3: memref<1xi32, #tpu.memory_space<smem>>) -> (i32, i32, i32) {
    %0 = arith.index_cast %arg0 : i32 to index
    %1 = memref.load %arg2[%0] : memref<6xi32, #tpu.memory_space<smem>>
    %c0_i32 = arith.constant 0 : i32
    %c0_i32_0 = arith.constant 0 : i32
    return %1, %arg1, %c0_i32 : i32, i32, i32
  }
  func.func @transform_3(%arg0: i32, %arg1: i32, %arg2: memref<6xi32, #tpu.memory_space<smem>>, %arg3: memref<1xi32, #tpu.memory_space<smem>>) -> (i32, i32) {
    %c0_i32 = arith.constant 0 : i32
    %c0_i32_0 = arith.constant 0 : i32
    return %arg0, %c0_i32 : i32, i32
  }
  func.func @transform_4(%arg0: i32, %arg1: i32, %arg2: memref<6xi32, #tpu.memory_space<smem>>, %arg3: memref<1xi32, #tpu.memory_space<smem>>) -> (i32, i32) {
    %c0_i32 = arith.constant 0 : i32
    %c0_i32_0 = arith.constant 0 : i32
    return %arg0, %c0_i32 : i32, i32
  }
}

</mosaic_0001>

<bundles_post_ra>
// kernel: custom-call
= control target key start
LH: loop header
LB: loop body
LE: loop exit
PB: predicated region body
PF: predicated region fallthrough
CT: control target
= control target key end

     0   :  { %s6_s0 = inlined_call_operand.vmem [shape: u32[6], index: 0, kind: output, shape index: {}]  }

// kernel: moe_feedforward.1
= control target key start
LH: loop header
LB: loop body
LE: loop exit
PB: predicated region body
PF: predicated region fallthrough
CT: control target
= control target key end

     0   :  { %s1840_s0 = inlined_call_operand.vmem [shape: s32[6], index: 0, kind: input, shape index: {}]   ;;  %s1841_s1 = inlined_call_operand.<no memory space> [shape: s32[1], index: 1, kind: input, shape index: {}]   ;;  %s1842_s2 = inlined_call_operand.vmem [shape: bf16[768,128], index: 2, kind: input, shape index: {}]   ;;  %s1843_s3 = inlined_call_operand.vmem [shape: bf16[5,3,128,256], index: 3, kind: input, shape index: {}]   ;;  %s1844_s4 = inlined_call_operand.vmem [shape: bf16[5,384,128], index: 4, kind: input, shape index: {}]   ;;  %s1845_s5 = inlined_call_operand.vmem [shape: f32[768,1], index: 5, kind: input, shape index: {}]   ;;  %s1846_s6 = inlined_call_operand.vmem [shape: f32[768,128], index: 6, kind: output, shape index: {}]  }
   0x1   :  { %1847 = sst [smem:[#allocation8_spill]] %s1842_s2  ;;  %s11_s23 = sshll.u32 %s1840_s0, 4  ;;  %s12_s23 = int_to_ptr.vmem [resolvable:$true] %s11_s23 }
   0x2   :  { %1848 = sst [smem:[#allocation9_spill]] %s1845_s5  ;;  %s1507_s26 = scalar_lea.vmem %s12_s23, 16 }
   0x3   :  { %15 = sst [smem:[#allocation5]] %s1841_s1  ;;  %p1508_p0 = scmp.ne.s32.totalorder %s12_s23, %s1507_s26 }
   0x4   :  { %p1512_p1 = scmp.lt.s32.totalorder %s12_s23, %s12_s23  ;;  %p1513_p2 = scmp.lt.s32.totalorder %s1507_s26, %s1507_s26 }
   0x6   :  { %p1514_p3 = por %p1513_p2, %p1512_p1 }
   0x8   :  { %p1515_p4 = pnand %p1514_p3, %p1508_p0 }
   0xa   :  { %1518 = shalt.err (!%p1515_p4)  }
   0xb   :  { %s1561_s27 = smov [#allocation4]  }
   0xc   :  { %14 = dma.vmem_to_smem %s12_s23, 16, %s1561_s27, [#allocation3] }
   0xd   :  { %1539 = dma.done.wait [#allocation3], 16 }
   0xe   :  { %1540 = vsyncadd [#allocation3], 4294967280 }
   0xf   :  { %17 = sfence }
  0x10   :  { %s1606_s28 = smov 0   ;;  %s1608_s0 = smov 0  }
  0x11   :  { %s1610_s29 = smov 0   ;;  %s1612_s1 = smov 0  }
  0x12   :  { %s1614_s30 = smov 0  }
  0x13 LB: > { %s32_s7 = sadd.s32 1, %s1551_s29  ;;  %s35_s8 = sadd.s32 1, %s1555_s1  ;;  %s1559_s30 = sphi %s1614_s30, %s23_s30   ;;  %s1555_s1 = sphi %s1612_s1, %s1857_s1   ;;  %s1551_s29 = sphi %s1610_s29, %s1856_s29   ;;  %s1547_s0 = sphi %s1608_s0, %s1855_s0   ;;  %s1543_s28 = sphi %s1606_s28, %s1854_s28  }
  0x14   : > { %p33_p5 = scmp.ge.s32.totalorder %s32_s7, 3  ;;  %p1243_p6 = scmp.ge.s32.totalorder %s1559_s30, 1 }
  0x15   : > { %p236_p7 = scmp.lt.s32.totalorder %s1559_s30, 19 }
  0x16   : > { %s1859_s7 = smov (%p33_p5, %s32_s7), 0  ;;  %s1861_s8 = smov (!%p33_p5, %s35_s8), %s1555_s1 }
  0x17   : > { %p237_p8 = pnand %p1243_p6, %p236_p7  ;;  %p37_p9 = scmp.ge.s32.totalorder %s1861_s8, 6 }
  0x18   : > { %s1244_s9 = sshll.u32 (!%p237_p8), %s1547_s0, 4  ;;  %s293_s10 = sld [smem:[#allocation4 + %s1547_s0]] (!%p237_p8) }
  0x19   : > { %s1863_s8 = smov (%p37_p9, %s1861_s8), 0  ;;  %240 = sbr.rel (%p237_p8) target bundleno = 748 (0x2ec), region = 36 }
  0x1a   : > { %1849 = sst [smem:[#allocation7_spill]] %s1863_s8  ;;  %p288_p10 = scmp.lt.s32.totalorder (!%p237_p8), %s1244_s9, 95 }
  0x1b   : > { %p296_p11 = scmp.lt.s32.totalorder (!%p237_p8), %s1543_s28, 2  ;;  %s304_s11 = sld [smem:[#allocation4 + %s1547_s0]] (!%p237_p8) }
  0x1c   : > { %s1248_s12 = sshll.u32 (!%p237_p8), %s1543_s28, 4  ;;  %s1851_s2 = sld [smem:[#allocation8_spill]] (!%p237_p8) }
  0x1d   : > { %p1646_p12 = scmp.lt.s32.totalorder (!%p237_p8), %s1248_s12, 47  ;;  %s1852_s5 = sld [smem:[#allocation9_spill]] (!%p237_p8) }
  0x1e   : > { %s1865_s9 = smov (!%p288_p10, %s1244_s9), 95  ;;  %p294_p13 = scmp.lt.s32.totalorder %s293_s10, 4 }
  0x1f   : > { %s297_s13 = scalar_select %p296_p11, %s1543_s28, 2 }
  0x20   : > { %s1245_s14 = sshll.u32 %s1865_s9, 2  ;;  %s1251_s20 = sshll.u32 %s1865_s9, 3 }
  0x21   : > { %s1246_s19 = sshll.u32 %s297_s13, 5  ;;  %s1867_s10 = smov (!%p294_p13, %s293_s10), 4 }
  0x22   : > { %s1653_s18 = scalar_lea.vmem %s1851_s2, %s1245_s14  ;;  %p306_p0 = scmp.lt.s32.totalorder %s304_s11, 4 }
  0x23   : > { %s1658_s23 = scalar_lea.vmem %s1852_s5, %s1251_s20  ;;  %s1355_s24 = smul.u32 96, %s1867_s10 }
  0x24   : > { %s1663_s27 = scalar_lea.vmem %s1846_s6, %s1251_s20  ;;  %s1869_s11 = smov (!%p306_p0, %s304_s11), 4 }
  0x25   : > { %s300_s16 = sadd.s32 %s1355_s24, %s1246_s19  ;;  %s329_s14 = sld [smem:[#allocation5]] }
  0x26   : > { %s1247_s17 = sshll.u32 %s300_s16, 2  ;;  %s1356_s2 = smul.u32 48, %s1869_s11 }
  0x27   : > { %s1668_s8 = scalar_lea.vmem %s1843_s3, %s1247_s17  ;;  %s1871_s12 = smov (!%p1646_p12, %s1248_s12), 47 }
  0x28   : > { %s311_s21 = sadd.s32 %s1356_s2, %s1871_s12 }
  0x29   : > { %s1249_s22 = sshll.u32 %s311_s21, 2 }
  0x2a   : > { %s1675_s25 = scalar_lea.vmem %s1844_s4, %s1249_s22 }
  0x2b   : > { %p1254_p1 = scmp.ge.s32.totalorder %s1547_s0, %s329_s14 }
  0x2c   : > { %p1255_p2 = scmp.ne.s32.totalorder (!%p1254_p1), %s1543_s28, 0 }
  0x2d   : > { %333 = sbr.rel (%p1254_p1) target bundleno = 748 (0x2ec), region = 40 }
  0x32   : > { %337 = sbr.rel (%p1255_p2) target bundleno = 64 (0x40), region = 44 }
  0x37   : > { %v1562_v0 = vmov 0.0  }
  0x38   : > { %338 = vst [vmem:[#allocation2 + $0x30] sm:$0xff] %v1562_v0  ;;  %339 = vst [vmem:[#allocation2] sm:$0xff] %v1562_v0 }
  0x39   : > { %340 = vst [vmem:[#allocation2 + $0x58] sm:$0xff] %v1562_v0  ;;  %341 = vst [vmem:[#allocation2 + $0x18] sm:$0xff] %v1562_v0 }
  0x3a   : > { %342 = vst [vmem:[#allocation2 + $0x50] sm:$0xff] %v1562_v0  ;;  %343 = vst [vmem:[#allocation2 + $0x68] sm:$0xff] %v1562_v0 }
  0x3b   : > { %344 = vst [vmem:[#allocation2 + $0x8] sm:$0xff] %v1562_v0  ;;  %345 = vst [vmem:[#allocation2 + $0x48] sm:$0xff] %v1562_v0 }
  0x3c   : > { %346 = vst [vmem:[#allocation2 + $0x40] sm:$0xff] %v1562_v0  ;;  %347 = vst [vmem:[#allocation2 + $0x20] sm:$0xff] %v1562_v0 }
  0x3d   : > { %348 = vst [vmem:[#allocation2 + $0x10] sm:$0xff] %v1562_v0  ;;  %349 = vst [vmem:[#allocation2 + $0x38] sm:$0xff] %v1562_v0 }
  0x3e   : > { %350 = vst [vmem:[#allocation2 + $0x60] sm:$0xff] %v1562_v0  ;;  %351 = vst [vmem:[#allocation2 + $0x70] sm:$0xff] %v1562_v0 }
  0x3f   : > { %352 = vst [vmem:[#allocation2 + $0x78] sm:$0xff] %v1562_v0  ;;  %353 = vst [vmem:[#allocation2 + $0x28] sm:$0xff] %v1562_v0 }
  0x40 PF: > { %v1401_v1 = vld [vmem:[%s1668_s8 + $0x74] ss:$8 sps:$4 sm:$0xff]   ;;  %v1403_v2 = vld [vmem:[%s1668_s8 + $0x70] ss:$8 sps:$4 sm:$0xff]   ;;  %v1563_v3 = vmov 0   ;;  %v1425_v18 = vld [vmem:[%s1653_s18] sm:$0xff]  }
  0x41   : > { %546 = vmatprep.mubr.bf16.mxu0 %v1563_v3  ;;  %514 = vmatprep.subr.bf16.mxu0 %v1401_v1  ;;  %v1404_v4 = vld [vmem:[%s1668_s8 + $0x64] ss:$8 sps:$4 sm:$0xff]   ;;  %v1406_v5 = vld [vmem:[%s1668_s8 + $0x60] ss:$8 sps:$4 sm:$0xff]   ;;  %v1407_v6 = vld [vmem:[%s1668_s8 + $0x54] ss:$8 sps:$4 sm:$0xff]  }
  0x42   : > { %515 = vmatpush1.bf16.msra.mxu0 %v1403_v2  ;;  %v1409_v7 = vld [vmem:[%s1668_s8 + $0x50] ss:$8 sps:$4 sm:$0xff]   ;;  %v1410_v8 = vld [vmem:[%s1668_s8 + $0x44] ss:$8 sps:$4 sm:$0xff]   ;;  %v1412_v9 = vld [vmem:[%s1668_s8 + $0x40] ss:$8 sps:$4 sm:$0xff]  }
  0x43   : > { %516 = vmatprep.subr.bf16.mxu0 %v1404_v4  ;;  %v1413_v10 = vld [vmem:[%s1668_s8 + $0x34] ss:$8 sps:$4 sm:$0xff]   ;;  %v1415_v11 = vld [vmem:[%s1668_s8 + $0x30] ss:$8 sps:$4 sm:$0xff]   ;;  %v1416_v12 = vld [vmem:[%s1668_s8 + $0x24] ss:$8 sps:$4 sm:$0xff]  }
  0x44   : > { %v1418_v13 = vld [vmem:[%s1668_s8 + $0x20] ss:$8 sps:$4 sm:$0xff]   ;;  %v1419_v14 = vld [vmem:[%s1668_s8 + $0x14] ss:$8 sps:$4 sm:$0xff]   ;;  %v1421_v15 = vld [vmem:[%s1668_s8 + $0x10] ss:$8 sps:$4 sm:$0xff]  }
  0x45   : > { %v1422_v16 = vld [vmem:[%s1668_s8 + $0x4] ss:$8 sps:$4 sm:$0xff]   ;;  %v1424_v17 = vld [vmem:[%s1668_s8] ss:$8 sps:$4 sm:$0xff]   ;;  %v1427_v20 = vld [vmem:[%s1653_s18 + $0x10] sm:$0xff]   ;;  %p1304_p3 = scmp.ne.s32.totalorder %s1543_s28, 2 }
  0x46   : > { %517 = vmatpush1.bf16.msra.mxu0 %v1406_v5  ;;  %v1426_v19 = vld [vmem:[%s1653_s18 + $0x8] sm:$0xff]   ;;  %v1428_v21 = vld [vmem:[%s1653_s18 + $0x18] sm:$0xff]   ;;  %v1429_v22 = vld [vmem:[%s1653_s18 + $0x20] sm:$0xff]  }
  0x47   : > { %518 = vmatprep.subr.bf16.mxu0 %v1407_v6  ;;  %v1430_v23 = vld [vmem:[%s1653_s18 + $0x28] sm:$0xff]   ;;  %v1431_v24 = vld [vmem:[%s1653_s18 + $0x30] sm:$0xff]   ;;  %v1432_v25 = vld [vmem:[%s1653_s18 + $0x38] sm:$0xff]  }
  0x48   : > { %v1433_v26 = vld [vmem:[%s1675_s25 + $0x38] sm:$0xff]   ;;  %v1434_v27 = vld [vmem:[%s1675_s25 + $0x30] sm:$0xff]   ;;  %v1435_v28 = vld [vmem:[%s1675_s25 + $0x28] sm:$0xff]  }
  0x49   : > { %1323 = vmatprep.subr.bf16.mxu1 %v1433_v26  ;;  %v1436_v29 = vld [vmem:[%s1675_s25 + $0x20] sm:$0xff]   ;;  %v1437_v30 = vld [vmem:[%s1675_s25 + $0x18] sm:$0xff]   ;;  %v1438_v31 = vld [vmem:[%s1675_s25 + $0x10] sm:$0xff]  }
  0x4a   : > { %519 = vmatpush1.bf16.msra.mxu0 %v1409_v7  ;;  %1324 = vmatpush3.bf16.msra.mxu1 %v1433_v26  ;;  %v1439_v32 = vld [vmem:[%s1675_s25 + $0x8] sm:$0xff]   ;;  %v1440_v33 = vld [vmem:[%s1675_s25] sm:$0xff]  }
  0x4b   : > { %520 = vmatprep.subr.bf16.mxu0 %v1410_v8  ;;  %1325 = vmatprep.subr.bf16.mxu1 %v1434_v27 }
  0x4e   : > { %521 = vmatpush1.bf16.msra.mxu0 %v1412_v9  ;;  %1326 = vmatpush3.bf16.msra.mxu1 %v1434_v27 }
  0x4f   : > { %522 = vmatprep.subr.bf16.mxu0 %v1413_v10  ;;  %1327 = vmatprep.subr.bf16.mxu1 %v1435_v28 }
  0x52   : > { %523 = vmatpush1.bf16.msra.mxu0 %v1415_v11  ;;  %1328 = vmatpush3.bf16.msra.mxu1 %v1435_v28 }
  0x53   : > { %524 = vmatprep.subr.bf16.mxu0 %v1416_v12  ;;  %1329 = vmatprep.subr.bf16.mxu1 %v1436_v29 }
  0x56   : > { %525 = vmatpush1.bf16.msra.mxu0 %v1418_v13  ;;  %1330 = vmatpush3.bf16.msra.mxu1 %v1436_v29 }
  0x57   : > { %526 = vmatprep.subr.bf16.mxu0 %v1419_v14  ;;  %1331 = vmatprep.subr.bf16.mxu1 %v1437_v30 }
  0x5a   : > { %527 = vmatpush1.bf16.msra.mxu0 %v1421_v15  ;;  %1332 = vmatpush3.bf16.msra.mxu1 %v1437_v30 }
  0x5b   : > { %528 = vmatprep.subr.bf16.mxu0 %v1422_v16  ;;  %1333 = vmatprep.subr.bf16.mxu1 %v1438_v31 }
  0x5e   : > { %529 = vmatpush1.bf16.msra.mxu0 %v1424_v17  ;;  %1334 = vmatpush3.bf16.msra.mxu1 %v1438_v31 }
  0x5f   : > { %1335 = vmatprep.subr.bf16.mxu1 %v1439_v32 }
  0x61   : > { %547 = vmatmul.mubr.bf16.vlgmr.msra.gmra.mxu0 %v1425_v18 }
  0x62   : > { %556 = vmatprep.mubr.bf16.mxu0 %v1563_v3  ;;  %1336 = vmatpush3.bf16.msra.mxu1 %v1439_v32 }
  0x63   : > { %1337 = vmatprep.subr.bf16.mxu1 %v1440_v33 }
  0x66   : > { %1338 = vmatpush3.bf16.msra.mxu1 %v1440_v33 }
  0x69   : > { %557 = vmatmul.mubr.bf16.gmra.mxu0 %v1426_v19 }
  0x6a   : > { %566 = vmatprep.mubr.bf16.mxu0 %v1563_v3 }
  0x71   : > { %567 = vmatmul.mubr.bf16.gmra.mxu0 %v1427_v20 }
  0x72   : > { %576 = vmatprep.mubr.bf16.mxu0 %v1563_v3 }
  0x79   : > { %577 = vmatmul.mubr.bf16.gmra.mxu0 %v1428_v21 }
  0x7a   : > { %586 = vmatprep.mubr.bf16.mxu0 %v1563_v3 }
  0x81   : > { %587 = vmatmul.mubr.bf16.gmra.mxu0 %v1429_v22 }
  0x82   : > { %596 = vmatprep.mubr.bf16.mxu0 %v1563_v3 }
  0x89   : > { %597 = vmatmul.mubr.bf16.gmra.mxu0 %v1430_v23 }
  0x8a   : > { %606 = vmatprep.mubr.bf16.mxu0 %v1563_v3 }
  0x91   : > { %607 = vmatmul.mubr.bf16.gmra.mxu0 %v1431_v24 }
  0x92   : > { %616 = vmatprep.mubr.bf16.mxu0 %v1563_v3 }
  0x99   : > { %617 = vmatmul.mubr.bf16.gmra.mxu0 %v1432_v25 }
 0x121   : > { %v548_v34 = vpop.f32.mrf.mxu0 }
 0x122   : > { %v1280_v35 = vmul.f32 -1.442695, %v548_v34 }
 0x123   : > { %v550_v36 = vpop.f32.mrf.mxu0 }
 0x124   : > { %1441 = vpow2.f32 %v1280_v35 }
 0x125   : > { %v552_v37 = vpop.f32.mrf.mxu0 }
 0x126   : > { %v1281_v38 = vmul.f32 -1.442695, %v552_v37 }
 0x127   : > { %v554_v39 = vpop.f32.mrf.mxu0 }
 0x128   : > { %1443 = vpow2.f32 %v1281_v38 }
 0x129   : > { %v1711_v40 = vpop.f32.mrf.mxu0 }
 0x12a   : > { %v1282_v41 = vmul.f32 -1.442695, %v1711_v40 }
 0x12b   : > { %v1714_v42 = vpop.f32.mrf.mxu0 }
 0x12c   : > { %1445 = vpow2.f32 %v1282_v41 }
 0x12d   : > { %v1716_v43 = vpop.f32.mrf.mxu0 }
 0x12e   : > { %v1283_v44 = vmul.f32 -1.442695, %v1716_v43 }
 0x12f   : > { %v1719_v45 = vpop.f32.mrf.mxu0 }
 0x130   : > { %1447 = vpow2.f32 %v1283_v44 }
 0x131   : > { %v1442_v46 = vpop.eup %1441  ;;  %v1721_v47 = vpop.f32.mrf.mxu0 }
 0x132   : > { %v675_v48 = vadd.f32 1.0, %v1442_v46  ;;  %v1284_v49 = vmul.f32 -1.442695, %v1721_v47 }
 0x133   : > { %v1724_v50 = vpop.f32.mrf.mxu0 }
 0x134   : > { %1449 = vrcp.f32 %v675_v48 }
 0x135   : > { %v1444_v51 = vpop.eup %1443  ;;  %1451 = vpow2.f32 %v1284_v49  ;;  %v1726_v52 = vpop.f32.mrf.mxu0 }
 0x136   : > { %v676_v53 = vadd.f32 1.0, %v1444_v51  ;;  %v1285_v54 = vmul.f32 -1.442695, %v1726_v52 }
 0x137   : > { %v1729_v55 = vpop.f32.mrf.mxu0 }
 0x138   : > { %1453 = vrcp.f32 %v676_v53 }
 0x139   : > { %v1446_v56 = vpop.eup %1445  ;;  %1455 = vpow2.f32 %v1285_v54  ;;  %v1731_v57 = vpop.f32.mrf.mxu0 }
 0x13a   : > { %v677_v58 = vadd.f32 1.0, %v1446_v56  ;;  %v1286_v59 = vmul.f32 -1.442695, %v1731_v57 }
 0x13b   : > { %v1734_v60 = vpop.f32.mrf.mxu0 }
 0x13c   : > { %1457 = vrcp.f32 %v677_v58 }
 0x13d   : > { %v1448_v61 = vpop.eup %1447  ;;  %1459 = vpow2.f32 %v1286_v59  ;;  %v1736_v62 = vpop.f32.mrf.mxu0 }
 0x13e   : > { %v678_v63 = vadd.f32 1.0, %v1448_v61  ;;  %v1287_v0 = vmul.f32 -1.442695, %v1736_v62 }
 0x13f   : > { %v1739_v1 = vpop.f32.mrf.mxu0 }
 0x140   : > { %1461 = vrcp.f32 %v678_v63 }
 0x141   : > { %v1450_v2 = vpop.eup %1449  ;;  %1463 = vpow2.f32 %v1287_v0  ;;  %v1741_v3 = vpop.f32.mrf.mxu0 }
 0x142   : > { %v1452_v4 = vpop.eup %1451  ;;  %v1288_v5 = vmul.f32 -1.442695, %v1741_v3  ;;  %v723_v8 = vmul.f32 %v1450_v2, %v548_v34 }
 0x143   : > { %v679_v6 = vadd.f32 1.0, %v1452_v4  ;;  %v1744_v7 = vpop.f32.mrf.mxu0 }
 0x144   : > { %1465 = vpow2.f32 %v1288_v5  ;;  %v739_v16 = vmul.f32 %v723_v8, %v550_v36 }
 0x145   : > { %v1454_v9 = vpop.eup %1453  ;;  %1467 = vrcp.f32 %v679_v6  ;;  %v1746_v10 = vpop.f32.mrf.mxu0 }
 0x146   : > { %v1456_v11 = vpop.eup %1455  ;;  %v724_v12 = vmul.f32 %v1454_v9, %v552_v37  ;;  %v1289_v13 = vmul.f32 -1.442695, %v1746_v10 }
 0x147   : > { %v680_v14 = vadd.f32 1.0, %v1456_v11  ;;  %v1749_v15 = vpop.f32.mrf.mxu0 }
 0x148   : > { %v740_v17 = vmul.f32 %v724_v12, %v554_v39  ;;  %1469 = vpow2.f32 %v1289_v13 }
 0x149   : > { %v1458_v18 = vpop.eup %1457  ;;  %1471 = vrcp.f32 %v680_v14  ;;  %v1751_v19 = vpop.f32.mrf.mxu0 }
 0x14a   : > { %v1460_v20 = vpop.eup %1459  ;;  %v1290_v21 = vmul.f32 -1.442695, %v1751_v19  ;;  %v755_v22 = vpack.c.bf16 %v740_v17, %v739_v16  ;;  %v725_v25 = vmul.f32 %v1458_v18, %v1711_v40 }
 0x14b   : > { %v681_v23 = vadd.f32 1.0, %v1460_v20  ;;  %v1754_v24 = vpop.f32.mrf.mxu0 }
 0x14c   : > { %1473 = vpow2.f32 %v1290_v21  ;;  %1339 = vmatprep.mubr.bf16.mxu1 %v755_v22  ;;  %v741_v33 = vmul.f32 %v725_v25, %v1714_v42 }
 0x14d   : > { %v1462_v26 = vpop.eup %1461  ;;  %1475 = vrcp.f32 %v681_v23  ;;  %v1757_v27 = vpop.f32.mrf.mxu0 }
 0x14e   : > { %v1464_v28 = vpop.eup %1463  ;;  %v726_v29 = vmul.f32 %v1462_v26, %v1716_v43  ;;  %v1291_v30 = vmul.f32 -1.442695, %v1757_v27 }
 0x14f   : > { %v682_v31 = vadd.f32 1.0, %v1464_v28  ;;  %v1761_v32 = vpop.f32.mrf.mxu0 }
 0x150   : > { %v742_v34 = vmul.f32 %v726_v29, %v1719_v45  ;;  %1477 = vpow2.f32 %v1291_v30 }
 0x151   : > { %v1466_v35 = vpop.eup %1465  ;;  %1479 = vrcp.f32 %v682_v31  ;;  %v1765_v36 = vpop.f32.mrf.mxu0 }
 0x152   : > { %v1468_v37 = vpop.eup %1467  ;;  %v756_v38 = vpack.c.bf16 %v742_v34, %v741_v33  ;;  %v683_v39 = vadd.f32 1.0, %v1466_v35  ;;  %v1292_v40 = vmul.f32 -1.442695, %v1765_v36 }
 0x153   : > { %v1768_v41 = vpop.f32.mrf.mxu0  ;;  %v727_v44 = vmul.f32 %v1468_v37, %v1721_v47 }
 0x154   : > { %1481 = vrcp.f32 %v683_v39  ;;  %1340 = vmatmul.mubr.bf16.vlgmr.msra.gmra.mxu1 %v756_v38 }
 0x155   : > { %v1470_v43 = vpop.eup %1469  ;;  %1483 = vpow2.f32 %v1292_v40  ;;  %v1771_v42 = vpop.f32.mrf.mxu0  ;;  %v743_v54 = vmul.f32 %v727_v44, %v1724_v50 }
 0x156   : > { %v1472_v45 = vpop.eup %1471  ;;  %v684_v46 = vadd.f32 1.0, %v1470_v43  ;;  %v1293_v48 = vmul.f32 -1.442695, %v1771_v42 }
 0x157   : > { %v728_v49 = vmul.f32 %v1472_v45, %v1726_v52  ;;  %v614_v51 = vpop.f32.mrf.mxu0  ;;  %v765_v45 = vld [vmem:[#allocation2 + $0x58] sm:$0xff] }
 0x158   : > { %1485 = vrcp.f32 %v684_v46 }
 0x159   : > { %v1474_v53 = vpop.eup %1473  ;;  %v744_v56 = vmul.f32 %v728_v49, %v1729_v55  ;;  %1487 = vpow2.f32 %v1293_v48  ;;  %v618_v58 = vpop.f32.mrf.mxu0 }
 0x15a   : > { %v1476_v59 = vpop.eup %1475  ;;  %v685_v47 = vadd.f32 1.0, %v1474_v53  ;;  %v1294_v61 = vmul.f32 -1.442695, %v618_v58  ;;  %v764_v53 = vld [vmem:[#allocation2] sm:$0xff] }
 0x15b   : > { %v757_v63 = vpack.c.bf16 %v744_v56, %v743_v54  ;;  %v620_v0 = vpop.f32.mrf.mxu0  ;;  %v729_v4 = vmul.f32 %v1476_v59, %v1731_v57  ;;  %v769_v59 = vld [vmem:[#allocation2 + $0x8] sm:$0xff] }
 0x15c   : > { %1489 = vrcp.f32 %v685_v47 }
 0x15d   : > { %v1478_v2 = vpop.eup %1477  ;;  %1491 = vpow2.f32 %v1294_v61  ;;  %1343 = vmatprep.mubr.bf16.mxu1 %v757_v63  ;;  %v622_v52 = vpop.f32.mrf.mxu0  ;;  %v745_v9 = vmul.f32 %v729_v4, %v1734_v60  ;;  %v767_v61 = vld [vmem:[#allocation2 + $0x50] sm:$0xff] }
 0x15e   : > { %v1480_v5 = vpop.eup %1479  ;;  %v686_v6 = vadd.f32 1.0, %v1478_v2  ;;  %v1295_v8 = vmul.f32 -1.442695, %v622_v52  ;;  %v770_v2 = vld [vmem:[#allocation2 + $0x48] sm:$0xff] }
 0x15f   : > { %v730_v50 = vmul.f32 %v1480_v5, %v1736_v62  ;;  %v624_v40 = vpop.f32.mrf.mxu0  ;;  %v768_v5 = vld [vmem:[#allocation2 + $0x68] sm:$0xff] }
 0x160   : > { %1493 = vrcp.f32 %v686_v6 }
 0x161   : > { %v1482_v55 = vpop.eup %1481  ;;  %v746_v11 = vmul.f32 %v730_v50, %v1739_v1  ;;  %1495 = vpow2.f32 %v1295_v8 }
 0x162   : > { %v1484_v12 = vpop.eup %1483  ;;  %v731_v57 = vmul.f32 %v1482_v55, %v1741_v3  ;;  %v773_v55 = vld [vmem:[#allocation2 + $0x10] sm:$0xff] }
 0x163   : > { %v758_v13 = vpack.c.bf16 %v746_v11, %v745_v9  ;;  %v687_v14 = vadd.f32 1.0, %v1484_v12  ;;  %v771_v11 = vld [vmem:[#allocation2 + $0x40] sm:$0xff] }
 0x164   : > { %v747_v62 = vmul.f32 %v731_v57, %v1744_v7 }
 0x165   : > { %v1486_v16 = vpop.eup %1485  ;;  %1497 = vrcp.f32 %v687_v14  ;;  %1344 = vmatmul.mubr.bf16.gmra.mxu1 %v758_v13  ;;  %v774_v14 = vld [vmem:[#allocation2 + $0x38] sm:$0xff] }
 0x166   : > { %v1488_v17 = vpop.eup %1487  ;;  %v732_v18 = vmul.f32 %v1486_v16, %v1746_v10 }
 0x167   : > { %v688_v20 = vadd.f32 1.0, %v1488_v17  ;;  %v772_v17 = vld [vmem:[#allocation2 + $0x20] sm:$0xff] }
 0x168   : > { %v748_v21 = vmul.f32 %v732_v18, %v1749_v15 }
 0x169   : > { %v1490_v60 = vpop.eup %1489  ;;  %1499 = vrcp.f32 %v688_v20 }
 0x16a   : > { %v1492_v1 = vpop.eup %1491  ;;  %v759_v22 = vpack.c.bf16 %v748_v21, %v747_v62  ;;  %v733_v25 = vmul.f32 %v1490_v60, %v1751_v19  ;;  %v777_v21 = vld [vmem:[#allocation2 + $0x78] sm:$0xff] }
 0x16b   : > { %v689_v23 = vadd.f32 1.0, %v1492_v1  ;;  %v775_v1 = vld [vmem:[#allocation2 + $0x60] sm:$0xff] }
 0x16c   : > { %1347 = vmatprep.mubr.bf16.mxu1 %v759_v22  ;;  %v749_v10 = vmul.f32 %v733_v25, %v1754_v24  ;;  %v778_v25 = vld [vmem:[#allocation2 + $0x28] sm:$0xff] }
 0x16d   : > { %v1494_v3 = vpop.eup %1493  ;;  %1501 = vrcp.f32 %v689_v23 }
 0x16e   : > { %v1496_v26 = vpop.eup %1495  ;;  %v734_v28 = vmul.f32 %v1494_v3, %v1757_v27 }
 0x16f   : > { %v690_v29 = vadd.f32 1.0, %v1496_v26 }
 0x170   : > { %v750_v7 = vmul.f32 %v734_v28, %v1761_v32  ;;  %v776_v28 = vld [vmem:[#allocation2 + $0x70] sm:$0xff] }
 0x171   : > { %1503 = vrcp.f32 %v690_v29 }
 0x172   : > { %v1498_v15 = vpop.eup %1497  ;;  %v760_v30 = vpack.c.bf16 %v750_v7, %v749_v10 }
 0x173   : > { %v735_v31 = vmul.f32 %v1498_v15, %v1765_v36  ;;  %v763_v36 = vld [vmem:[#allocation2 + $0x30] sm:$0xff] }
 0x174   : > { %1348 = vmatmul.mubr.bf16.gmra.mxu1 %v760_v30 }
 0x175   : > { %v751_v34 = vmul.f32 %v735_v31, %v1768_v41 }
 0x176   : > { %v1500_v33 = vpop.eup %1499 }
 0x177   : > { %v736_v19 = vmul.f32 %v1500_v33, %v1771_v42  ;;  %v766_v42 = vld [vmem:[#allocation2 + $0x18] sm:$0xff] }
 0x179   : > { %v752_v35 = vmul.f32 %v736_v19, %v614_v51 }
 0x17a   : > { %v1502_v37 = vpop.eup %1501 }
 0x17b   : > { %v761_v38 = vpack.c.bf16 %v752_v35, %v751_v34  ;;  %v737_v27 = vmul.f32 %v1502_v37, %v618_v58 }
 0x17d   : > { %1351 = vmatprep.mubr.bf16.mxu1 %v761_v38  ;;  %v753_v32 = vmul.f32 %v737_v27, %v620_v0 }
 0x17e   : > { %v1504_v39 = vpop.eup %1503 }
 0x17f   : > { %v738_v24 = vmul.f32 %v1504_v39, %v622_v52 }
 0x181   : > { %v754_v43 = vmul.f32 %v738_v24, %v624_v40 }
 0x183   : > { %v762_v44 = vpack.c.bf16 %v754_v43, %v753_v32 }
 0x185   : > { %1352 = vmatmul.mubr.bf16.gmra.mxu1 %v762_v44 }
 0x214   : > { %v1341_v46 = vpop.f32.mrf.mxu1 }
 0x215   : > { %v942_v48 = vadd.f32 %v1341_v46, %v765_v45 }
 0x216   : > { %v877_v49 = vpop.f32.mrf.mxu1 }
 0x217   : > { %958 = vst [vmem:[#allocation2 + $0x58] sm:$0xff] %v942_v48  ;;  %v940_v41 = vadd.f32 %v877_v49, %v763_v36 }
 0x218   : > { %v1342_v51 = vpop.f32.mrf.mxu1 }
 0x219   : > { %956 = vst [vmem:[#allocation2 + $0x30] sm:$0xff] %v940_v41  ;;  %v943_v54 = vadd.f32 %v1342_v51, %v766_v42 }
 0x21a   : > { %v880_v56 = vpop.f32.mrf.mxu1 }
 0x21b   : > { %959 = vst [vmem:[#allocation2 + $0x18] sm:$0xff] %v943_v54  ;;  %v941_v58 = vadd.f32 %v880_v56, %v764_v53 }
 0x21d   : > { %957 = vst [vmem:[#allocation2] sm:$0xff] %v941_v58 }
 0x225   : > { %v1345_v47 = vpop.f32.mrf.mxu1 }
 0x226   : > { %v946_v63 = vadd.f32 %v1345_v47, %v769_v59 }
 0x227   : > { %v893_v0 = vpop.f32.mrf.mxu1 }
 0x228   : > { %962 = vst [vmem:[#allocation2 + $0x8] sm:$0xff] %v946_v63  ;;  %v944_v4 = vadd.f32 %v893_v0, %v767_v61 }
 0x229   : > { %v1346_v52 = vpop.f32.mrf.mxu1 }
 0x22a   : > { %960 = vst [vmem:[#allocation2 + $0x50] sm:$0xff] %v944_v4  ;;  %v947_v6 = vadd.f32 %v1346_v52, %v770_v2 }
 0x22b   : > { %v896_v8 = vpop.f32.mrf.mxu1 }
 0x22c   : > { %963 = vst [vmem:[#allocation2 + $0x48] sm:$0xff] %v947_v6  ;;  %v945_v50 = vadd.f32 %v896_v8, %v768_v5 }
 0x22e   : > { %961 = vst [vmem:[#allocation2 + $0x68] sm:$0xff] %v945_v50 }
 0x234   : > { %v1349_v9 = vpop.f32.mrf.mxu1 }
 0x235   : > { %v950_v12 = vadd.f32 %v1349_v9, %v773_v55 }
 0x236   : > { %v909_v13 = vpop.f32.mrf.mxu1 }
 0x237   : > { %966 = vst [vmem:[#allocation2 + $0x10] sm:$0xff] %v950_v12  ;;  %v948_v57 = vadd.f32 %v909_v13, %v771_v11 }
 0x238   : > { %v1350_v16 = vpop.f32.mrf.mxu1 }
 0x239   : > { %964 = vst [vmem:[#allocation2 + $0x40] sm:$0xff] %v948_v57  ;;  %v951_v18 = vadd.f32 %v1350_v16, %v774_v14 }
 0x23a   : > { %v912_v20 = vpop.f32.mrf.mxu1 }
 0x23b   : > { %967 = vst [vmem:[#allocation2 + $0x38] sm:$0xff] %v951_v18  ;;  %v949_v62 = vadd.f32 %v912_v20, %v772_v17 }
 0x23d   : > { %965 = vst [vmem:[#allocation2 + $0x20] sm:$0xff] %v949_v62 }
 0x245   : > { %v1353_v60 = vpop.f32.mrf.mxu1 }
 0x246   : > { %v954_v22 = vadd.f32 %v1353_v60, %v777_v21 }
 0x247   : > { %v925_v23 = vpop.f32.mrf.mxu1 }
 0x248   : > { %970 = vst [vmem:[#allocation2 + $0x78] sm:$0xff] %v954_v22  ;;  %v952_v3 = vadd.f32 %v925_v23, %v775_v1 }
 0x249   : > { %v1354_v26 = vpop.f32.mrf.mxu1 }
 0x24a   : > { %968 = vst [vmem:[#allocation2 + $0x60] sm:$0xff] %v952_v3  ;;  %v955_v29 = vadd.f32 %v1354_v26, %v778_v25  ;;  %975 = sbr.rel (%p1304_p3) target bundleno = 748 (0x2ec), region = 48 }
 0x24b   : > { %v928_v10 = vpop.f32.mrf.mxu1 }
 0x24c   : > { %971 = vst [vmem:[#allocation2 + $0x28] sm:$0xff] %v955_v29  ;;  %v953_v7 = vadd.f32 %v928_v10, %v776_v28 }
 0x24e   : > { %969 = vst [vmem:[#allocation2 + $0x70] sm:$0xff] %v953_v7 }
 0x24f   : > { %v994_v15 = vld [vmem:[%s1658_s23 + $0x10] sm:$0xff]  ;;  %v992_v30 = vld [vmem:[%s1658_s23] sm:$0xff]  ;;  %v1564_v31 = vmov 0   ;;  %v995_v33 = vld [vmem:[%s1658_s23 + $0x18] sm:$0xff] }
 0x250   : > { %1506 = vset.pattern.permute.xlu1 %v1564_v31  ;;  %1505 = vset.pattern.permute.xlu0 %v1564_v31  ;;  %v993_v19 = vld [vmem:[%s1658_s23 + $0x8] sm:$0xff]  ;;  %v996_v35 = vld [vmem:[%s1658_s23 + $0x20] sm:$0xff]  ;;  %v999_v37 = vld [vmem:[%s1658_s23 + $0x38] sm:$0xff] }
 0x251   : > { %1020 = vperm.xlu1 %1506, %v994_v15   ;;  %1010 = vperm.xlu0 %1505, %v992_v30   ;;  %v997_v34 = vld [vmem:[%s1658_s23 + $0x28] sm:$0xff]  ;;  %v998_v38 = vld [vmem:[%s1658_s23 + $0x30] sm:$0xff]  ;;  %v1000_v39 = vld [vmem:[%s1658_s23 + $0x40] sm:$0xff] }
 0x252   : > { %v1001_v27 = vld [vmem:[%s1658_s23 + $0x48] sm:$0xff]  ;;  %v1003_v24 = vld [vmem:[%s1658_s23 + $0x58] sm:$0xff]  ;;  %v1002_v40 = vld [vmem:[%s1658_s23 + $0x50] sm:$0xff] }
 0x253   : > { %v1005_v32 = vld [vmem:[%s1658_s23 + $0x68] sm:$0xff]  ;;  %v1004_v43 = vld [vmem:[%s1658_s23 + $0x60] sm:$0xff]  ;;  %v1007_v44 = vld [vmem:[%s1658_s23 + $0x78] sm:$0xff] }
 0x254   : > { %v1006_v45 = vld [vmem:[%s1658_s23 + $0x70] sm:$0xff]  ;;  %v978_v46 = vld [vmem:[#allocation2 + $0x58] sm:$0xff]  ;;  %v976_v36 = vld [vmem:[#allocation2 + $0x30] sm:$0xff] }
 0x255   : > { %1025 = vperm.xlu1 %1506, %v995_v33   ;;  %1015 = vperm.xlu0 %1505, %v993_v19   ;;  %v979_v51 = vld [vmem:[#allocation2 + $0x18] sm:$0xff]  ;;  %v977_v53 = vld [vmem:[#allocation2] sm:$0xff]  ;;  %v981_v47 = vld [vmem:[#allocation2 + $0x68] sm:$0xff] }
 0x256   : > { %v980_v61 = vld [vmem:[#allocation2 + $0x50] sm:$0xff]  ;;  %v983_v52 = vld [vmem:[#allocation2 + $0x48] sm:$0xff]  ;;  %v985_v9 = vld [vmem:[#allocation2 + $0x20] sm:$0xff] }
 0x257   : > { %v982_v5 = vld [vmem:[#allocation2 + $0x8] sm:$0xff]  ;;  %v984_v11 = vld [vmem:[#allocation2 + $0x40] sm:$0xff]  ;;  %v987_v16 = vld [vmem:[#allocation2 + $0x38] sm:$0xff] }
 0x258   : > { %v986_v17 = vld [vmem:[#allocation2 + $0x10] sm:$0xff]  ;;  %v988_v1 = vld [vmem:[#allocation2 + $0x60] sm:$0xff]  ;;  %v991_v26 = vld [vmem:[#allocation2 + $0x28] sm:$0xff] }
 0x259   : > { %1035 = vperm.xlu1 %1506, %v997_v34   ;;  %1030 = vperm.xlu0 %1505, %v996_v35   ;;  %v989_v60 = vld [vmem:[#allocation2 + $0x70] sm:$0xff]  ;;  %v990_v28 = vld [vmem:[#allocation2 + $0x78] sm:$0xff] }
 0x25d   : > { %1045 = vperm.xlu1 %1506, %v999_v37   ;;  %1040 = vperm.xlu0 %1505, %v998_v38  }
 0x261   : > { %1055 = vperm.xlu1 %1506, %v1001_v27   ;;  %1050 = vperm.xlu0 %1505, %v1000_v39  }
 0x265   : > { %1065 = vperm.xlu1 %1506, %v1003_v24   ;;  %1060 = vperm.xlu0 %1505, %v1002_v40  }
 0x269   : > { %1075 = vperm.xlu1 %1506, %v1005_v32   ;;  %1070 = vperm.xlu0 %1505, %v1004_v43  }
 0x26d   : > { %1085 = vperm.xlu1 %1506, %v1007_v44   ;;  %1080 = vperm.xlu0 %1505, %v1006_v45  }
 0x2cc   : > { %v1021_v48 = vpop.permute.xlu1 %1020  ;;  %v1011_v49 = vpop.permute.xlu0 %1010 }
 0x2cd   : > { %v1090_v42 = vmul.f32 %v1021_v48, %v978_v46  ;;  %v1088_v41 = vmul.f32 %v1011_v49, %v976_v36 }
 0x2cf   : > { %1106 = vst [vmem:[%s1663_s27 + $0x10] sm:$0xff] %v1090_v42  ;;  %1104 = vst [vmem:[%s1663_s27] sm:$0xff] %v1088_v41 }
 0x2d0   : > { %v1026_v54 = vpop.permute.xlu1 %1025  ;;  %v1016_v56 = vpop.permute.xlu0 %1015 }
 0x2d1   : > { %v1091_v58 = vmul.f32 %v1026_v54, %v979_v51  ;;  %v1089_v59 = vmul.f32 %v1016_v56, %v977_v53 }
 0x2d3   : > { %1107 = vst [vmem:[%s1663_s27 + $0x18] sm:$0xff] %v1091_v58  ;;  %1105 = vst [vmem:[%s1663_s27 + $0x8] sm:$0xff] %v1089_v59 }
 0x2d4   : > { %v1036_v63 = vpop.permute.xlu1 %1035  ;;  %v1031_v0 = vpop.permute.xlu0 %1030 }
 0x2d5   : > { %v1093_v2 = vmul.f32 %v1036_v63, %v981_v47  ;;  %v1092_v4 = vmul.f32 %v1031_v0, %v980_v61 }
 0x2d7   : > { %1109 = vst [vmem:[%s1663_s27 + $0x28] sm:$0xff] %v1093_v2  ;;  %1108 = vst [vmem:[%s1663_s27 + $0x20] sm:$0xff] %v1092_v4 }
 0x2d8   : > { %v1046_v6 = vpop.permute.xlu1 %1045  ;;  %v1041_v8 = vpop.permute.xlu0 %1040 }
 0x2d9   : > { %v1095_v50 = vmul.f32 %v1046_v6, %v983_v52  ;;  %v1094_v55 = vmul.f32 %v1041_v8, %v982_v5 }
 0x2db   : > { %1111 = vst [vmem:[%s1663_s27 + $0x38] sm:$0xff] %v1095_v50  ;;  %1110 = vst [vmem:[%s1663_s27 + $0x30] sm:$0xff] %v1094_v55 }
 0x2dc   : > { %v1056_v12 = vpop.permute.xlu1 %1055  ;;  %v1051_v13 = vpop.permute.xlu0 %1050 }
 0x2dd   : > { %v1097_v14 = vmul.f32 %v1056_v12, %v985_v9  ;;  %v1096_v57 = vmul.f32 %v1051_v13, %v984_v11 }
 0x2df   : > { %1113 = vst [vmem:[%s1663_s27 + $0x48] sm:$0xff] %v1097_v14  ;;  %1112 = vst [vmem:[%s1663_s27 + $0x40] sm:$0xff] %v1096_v57 }
 0x2e0   : > { %v1066_v18 = vpop.permute.xlu1 %1065  ;;  %v1061_v20 = vpop.permute.xlu0 %1060 }
 0x2e1   : > { %v1099_v62 = vmul.f32 %v1066_v18, %v987_v16  ;;  %v1098_v21 = vmul.f32 %v1061_v20, %v986_v17 }
 0x2e3   : > { %1115 = vst [vmem:[%s1663_s27 + $0x58] sm:$0xff] %v1099_v62  ;;  %1114 = vst [vmem:[%s1663_s27 + $0x50] sm:$0xff] %v1098_v21 }
 0x2e4   : > { %v1076_v22 = vpop.permute.xlu1 %1075  ;;  %v1071_v23 = vpop.permute.xlu0 %1070 }
 0x2e5   : > { %v1101_v25 = vmul.f32 %v1076_v22, %v989_v60  ;;  %v1100_v3 = vmul.f32 %v1071_v23, %v988_v1 }
 0x2e7   : > { %1117 = vst [vmem:[%s1663_s27 + $0x68] sm:$0xff] %v1101_v25  ;;  %1116 = vst [vmem:[%s1663_s27 + $0x60] sm:$0xff] %v1100_v3 }
 0x2e8   : > { %v1086_v29 = vpop.permute.xlu1 %1085  ;;  %v1081_v10 = vpop.permute.xlu0 %1080 }
 0x2e9   : > { %v1103_v7 = vmul.f32 %v1086_v29, %v991_v26  ;;  %v1102_v15 = vmul.f32 %v1081_v10, %v990_v28 }
 0x2eb   : > { %1119 = vst [vmem:[%s1663_s27 + $0x78] sm:$0xff] %v1103_v7  ;;  %1118 = vst [vmem:[%s1663_s27 + $0x70] sm:$0xff] %v1102_v15 }
 0x2ec PF: > { %s23_s30 = sadd.s32 1, %s1559_s30   ;;  %s1853_s2 = sld [smem:[#allocation7_spill]] }
 0x2ed   : > { %p20_p4 = scmp.ge.s32.totalorder %s23_s30, 20   ;;  %s1854_s28 = smov %s1551_s29 }
 0x2ee   : > { %s1855_s0 = smov %s1555_s1  ;;  %s1856_s29 = smov %s1859_s7 }
 0x2ef   :  { %22 = sbr.rel (!%p20_p4) target bundleno = 19 (0x13), region = 87 }
 0x2f2   : > { %s1857_s1 = smov %s1853_s2 }

</bundles_post_ra>
